<compile_context>
chip_gen: v7x
topology: tpu7x:2x2x1
jax: 0.10.0
libtpu: 0.0.40
codegen_flags: <defaults>
</compile_context>

<pallas_src>
import functools

import jax
import jax.numpy as jnp
import numpy as np
from jax.experimental import pallas as pl
from jax.experimental.pallas import tpu as pltpu


# ------------------------- activation helpers -------------------------------
def _act(name):
    if name == "none":
        return lambda x: x
    if name == "relu":
        return lambda x: jnp.maximum(x, 0.0)
    if name == "sigmoid":
        return jax.nn.sigmoid
    if name == "tanh":
        return jnp.tanh
    raise ValueError(f"Activation {name} not implemented yet")


# ------------------------------ kernel ---------------------------------------
def _rnn_kernel(obs_ref, gate_ref, h0_ref, wmat_ref, bt_ref, we_ref, be_ref,
                wp_ref, bp_ref,                 # inputs (all VMEM resident)
                hs_ref, preds_ref,              # outputs: (B, S*H), (B, S)
                *, hidden_act, output_act, seq_len, fold, use_bf16_mxu):
    hact = _act(hidden_act)
    oact = _act(output_act)

    S = seq_len
    B = obs_ref.shape[1]
    H = we_ref.shape[1]

    # ---- hoisted loads (live in vregs across the whole kernel) ----
    we = we_ref[...]                                   # (1, H) embedding weight row
    be = be_ref[...]                                   # (1, H) embedding bias
    bt = bt_ref[...]                                   # (1, H) transition bias
    bp = bp_ref[...]                                   # (1, 1) predict bias
    wp_b = jnp.broadcast_to(wp_ref[...], (B, H))       # (B, H) predict weight row

    obs = obs_ref[...]                                 # (S, B, 1)
    gate = gate_ref[...]                               # (S, B, 1)

    # ---- precompute everything that does not depend on h (off the chain) ----
    emb_obs = obs * we + be                            # (S, B, H)
    one_minus_gate = 1.0 - gate                        # (S, B, 1)

    wmat = wmat_ref[...]                               # (H, 2H) packed, or (H, H)
    if use_bf16_mxu:
        wmat = wmat.astype(jnp.bfloat16)

    # h0 broadcast hoisted; step-0 hidden state.
    h = hact(jnp.broadcast_to(h0_ref[...], (B, H)))
    hs_list = []

    if fold:
        # Fast path (output_act == 'none'): emb_pred_i = h_{i-1} @ (wp @ we) + (bp*we + be)
        # folded into one packed matmul per step.
        c_pred = bp * we + be                                        # (1, H)
        const = bt + gate * emb_obs + one_minus_gate * c_pred        # (S, B, H)
        for i in range(S):
            lhs = h.astype(jnp.bfloat16) if use_bf16_mxu else h
            mm = jnp.dot(lhs, wmat, preferred_element_type=jnp.float32)   # (B, 2H)
            h = hact(mm[:, :H] + one_minus_gate[i] * mm[:, H:] + const[i])
            hs_list.append(h)
        # Predictions computed once, after the loop (exact for output_act=='none').
        pred_cols = [jnp.sum(hi * wp_b, axis=-1, keepdims=True) for hi in hs_list]
        preds = jnp.concatenate(pred_cols, axis=-1) + bp             # (B, S)
        preds_ref[...] = oact(preds)                                 # identity here
    else:
        # General output activation: pred stays in the recurrence, but obs/gate/bias
        # terms are still precomputed and stores are still batched.
        base = bt + gate * emb_obs                                   # (S, B, H)
        pred = jnp.sum(h * wp_b, axis=-1, keepdims=True) + bp        # (B, 1), no out_act
        pred_cols = []
        for i in range(S):
            emb_pred = pred * we + be                                # (B, H)
            lhs = h.astype(jnp.bfloat16) if use_bf16_mxu else h
            h = hact(jnp.dot(lhs, wmat, preferred_element_type=jnp.float32)
                     + base[i] + one_minus_gate[i] * emb_pred)
            pred = oact(jnp.sum(h * wp_b, axis=-1, keepdims=True) + bp)
            hs_list.append(h)
            pred_cols.append(pred)
        preds_ref[...] = jnp.concatenate(pred_cols, axis=-1)         # (B, S)

    # Single lane-dense store of all hidden states: (B, S*H) = 2 full vregs.
    hs_ref[...] = jnp.concatenate(hs_list, axis=-1)


# ------------------------------ wrapper ---------------------------------------
def vanilla_rnn_forward(observation, input_or_rnn, params,
                        hidden_act="tanh", output_act="none",
                        use_bf16_mxu=False):
    """observation, input_or_rnn: (seq, batch) float32.

    Returns (hs, preds) with shapes (S, B, H) and (S, B, T)."""
    S, B = observation.shape
    H = params["w_trans"].shape[0]
    I = params["w_emb"].shape[0]
    T = params["w_pred"].shape[1]
    assert I == 1 and T == 1, "forward() semantics require i_size == t_size == 1"

    obs = observation.astype(jnp.float32)[:, :, None]       # (S, B, 1)
    gate = input_or_rnn.astype(jnp.float32)[:, :, None]     # (S, B, 1)
    wp_row = params["w_pred"].astype(jnp.float32).T          # (1, H)

    fold = (output_act == "none")
    if fold:
        # Packed weight: [w_trans | outer(w_pred, w_emb)] -> (H, 2H).
        wmat = jnp.concatenate(
            [params["w_trans"].astype(jnp.float32),
             params["w_pred"].astype(jnp.float32) @ params["w_emb"].astype(jnp.float32)],
            axis=1)
    else:
        wmat = params["w_trans"].astype(jnp.float32)

    kernel = functools.partial(_rnn_kernel, hidden_act=hidden_act,
                               output_act=output_act, seq_len=S,
                               fold=fold, use_bf16_mxu=use_bf16_mxu)

    def vmem_spec():
        return pl.BlockSpec(memory_space=pltpu.MemorySpace.VMEM)

    hs_packed, preds_bs = pl.pallas_call(
        kernel,
        out_shape=(
            jax.ShapeDtypeStruct((B, S * H), jnp.float32),   # hidden states, lane-dense
            jax.ShapeDtypeStruct((B, S), jnp.float32),       # predictions, lane-dense
        ),
        in_specs=[vmem_spec() for _ in range(9)],
        out_specs=(vmem_spec(), vmem_spec()),
    )(obs, gate,
      params["hidden_init"], wmat, params["b_trans"],
      params["w_emb"], params["b_emb"], wp_row, params["b_pred"])

    hs = hs_packed.reshape(B, S, H).transpose(1, 0, 2)       # (S, B, H) — module layout
    preds = preds_bs.T[:, :, None]                           # (S, B, 1) — module layout
    return hs, preds


# --------------------------- pure-JAX reference --------------------------------
def vanilla_rnn_reference(observation, input_or_rnn, params,
                          hidden_act="tanh", output_act="none"):
    hact, oact = _act(hidden_act), _act(output_act)
    S, B = observation.shape
    h = hact(jnp.tile(params["hidden_init"], (B, 1)))
    pred = h @ params["w_pred"] + params["b_pred"]
    hs, preds = [], []
    for i in range(S):
        obs_col = observation[i][:, None]
        gate = input_or_rnn[i][:, None]
        emb_o = obs_col @ params["w_emb"] + params["b_emb"]
        emb_p = pred @ params["w_emb"] + params["b_emb"]
        hidden_input = gate * emb_o + (1.0 - gate) * emb_p
        h = hact(h @ params["w_trans"] + params["b_trans"] + hidden_input)
        pred = oact(h @ params["w_pred"] + params["b_pred"])
        hs.append(h)
        preds.append(pred)
    return jnp.stack(hs), jnp.stack(preds)


# ------------------------------ main ------------------------------------------
if __name__ == "__main__":
    # par: batch_size=8, seq=8, h_size=32, i_size=1, t_size=1,
    #      hidden_act='tanh', output_act='none', linear_std=0.1, hidden_init_std=0.1
    B, S, H, I, T = 8, 8, 32, 1, 1
    linear_std, hidden_init_std = 0.1, 0.1

    key = jax.random.PRNGKey(0)
    ks = jax.random.split(key, 8)

    params = {
        "hidden_init": hidden_init_std * jax.random.normal(ks[0], (1, H), jnp.float32),
        # weights stored as (in, out); biases zero-init as in _init_weights
        "w_trans": linear_std * jax.random.normal(ks[1], (H, H), jnp.float32),
        "b_trans": jnp.zeros((1, H), jnp.float32),
        "w_emb": linear_std * jax.random.normal(ks[2], (I, H), jnp.float32),
        "b_emb": jnp.zeros((1, H), jnp.float32),
        "w_pred": linear_std * jax.random.normal(ks[3], (H, T), jnp.float32),
        "b_pred": jnp.zeros((1, T), jnp.float32),
    }
    # TODO(synk): transition_init='orthogonal'/'identity' variants not reproduced;
    # plain normal init (the fall-through branch of _init_weights) is used.

    observation = jax.random.normal(ks[4], (S, B), jnp.float32)
    input_or_rnn = (jax.random.uniform(ks[5], (S, B)) > 0.5).astype(jnp.float32)

    # ---- fast path: output_act == 'none' (module default) ----
    hs, preds = jax.block_until_ready(
        vanilla_rnn_forward(observation, input_or_rnn, params,
                            hidden_act="tanh", output_act="none")
    )
    hs_ref, preds_ref = vanilla_rnn_reference(
        observation, input_or_rnn, params, hidden_act="tanh", output_act="none")

    assert hs.shape == (S, B, H) and preds.shape == (S, B, T)
    np.testing.assert_allclose(np.asarray(hs), np.asarray(hs_ref), rtol=2e-3, atol=2e-3)
    np.testing.assert_allclose(np.asarray(preds), np.asarray(preds_ref), rtol=2e-3, atol=2e-3)

    # ---- general path: non-'none' output activation keeps pred in the loop ----
    hs2, preds2 = jax.block_until_ready(
        vanilla_rnn_forward(observation, input_or_rnn, params,
                            hidden_act="tanh", output_act="sigmoid")
    )
    hs2_ref, preds2_ref = vanilla_rnn_reference(
        observation, input_or_rnn, params, hidden_act="tanh", output_act="sigmoid")
    np.testing.assert_allclose(np.asarray(hs2), np.asarray(hs2_ref), rtol=2e-3, atol=2e-3)
    np.testing.assert_allclose(np.asarray(preds2), np.asarray(preds2_ref), rtol=2e-3, atol=2e-3)

    print("KERNEL_OK")
</pallas_src>

<mosaic_0001>
module attributes {stable_mosaic.version = 11 : i64} {
  func.func @_rnn_kernel(%arg0: memref<8x8x1xf32, #tpu.memory_space<vmem>>, %arg1: memref<8x8x1xf32, #tpu.memory_space<vmem>>, %arg2: memref<1x32xf32, #tpu.memory_space<vmem>>, %arg3: memref<32x64xf32, #tpu.memory_space<vmem>>, %arg4: memref<1x32xf32, #tpu.memory_space<vmem>>, %arg5: memref<1x32xf32, #tpu.memory_space<vmem>>, %arg6: memref<1x32xf32, #tpu.memory_space<vmem>>, %arg7: memref<1x32xf32, #tpu.memory_space<vmem>>, %arg8: memref<1x1xf32, #tpu.memory_space<vmem>>, %arg9: memref<8x256xf32, #tpu.memory_space<vmem>>, %arg10: memref<8x8xf32, #tpu.memory_space<vmem>>) attributes {dimension_semantics = [], scalar_prefetch = 0 : i64, scratch_operands = 0 : i64, tpu.core_type = #tpu.core_type<tc>} {
    %c0 = arith.constant 0 : index
    %c0_0 = arith.constant 0 : index
    %0 = vector.load %arg5[%c0, %c0_0] : memref<1x32xf32, #tpu.memory_space<vmem>>, vector<1x32xf32>
    %c0_1 = arith.constant 0 : index
    %c0_2 = arith.constant 0 : index
    %1 = vector.load %arg6[%c0_1, %c0_2] : memref<1x32xf32, #tpu.memory_space<vmem>>, vector<1x32xf32>
    %c0_3 = arith.constant 0 : index
    %c0_4 = arith.constant 0 : index
    %2 = vector.load %arg4[%c0_3, %c0_4] : memref<1x32xf32, #tpu.memory_space<vmem>>, vector<1x32xf32>
    %c0_5 = arith.constant 0 : index
    %c0_6 = arith.constant 0 : index
    %3 = vector.load %arg8[%c0_5, %c0_6] : memref<1x1xf32, #tpu.memory_space<vmem>>, vector<1x1xf32>
    %c0_7 = arith.constant 0 : index
    %c0_8 = arith.constant 0 : index
    %4 = vector.load %arg7[%c0_7, %c0_8] : memref<1x32xf32, #tpu.memory_space<vmem>>, vector<1x32xf32>
    %5 = vector.shape_cast %4 : vector<1x32xf32> to vector<1x32xf32>
    %6 = vector.broadcast %5 : vector<1x32xf32> to vector<8x32xf32>
    %c0_9 = arith.constant 0 : index
    %c0_10 = arith.constant 0 : index
    %c0_11 = arith.constant 0 : index
    %7 = vector.load %arg0[%c0_9, %c0_10, %c0_11] : memref<8x8x1xf32, #tpu.memory_space<vmem>>, vector<8x8x1xf32>
    %c0_12 = arith.constant 0 : index
    %c0_13 = arith.constant 0 : index
    %c0_14 = arith.constant 0 : index
    %8 = vector.load %arg1[%c0_12, %c0_13, %c0_14] : memref<8x8x1xf32, #tpu.memory_space<vmem>>, vector<8x8x1xf32>
    %9 = vector.shape_cast %0 : vector<1x32xf32> to vector<1x1x32xf32>
    %10 = vector.broadcast %7 : vector<8x8x1xf32> to vector<8x8x32xf32>
    %11 = vector.broadcast %9 : vector<1x1x32xf32> to vector<8x8x32xf32>
    %12 = arith.mulf %10, %11 : vector<8x8x32xf32>
    %13 = vector.shape_cast %1 : vector<1x32xf32> to vector<1x1x32xf32>
    %14 = vector.broadcast %13 : vector<1x1x32xf32> to vector<8x8x32xf32>
    %15 = arith.addf %12, %14 : vector<8x8x32xf32>
    %cst = arith.constant 1.000000e+00 : f32
    %16 = vector.broadcast %cst : f32 to vector<8x8x1xf32>
    %17 = arith.subf %16, %8 : vector<8x8x1xf32>
    %c0_15 = arith.constant 0 : index
    %c0_16 = arith.constant 0 : index
    %18 = vector.load %arg3[%c0_15, %c0_16] : memref<32x64xf32, #tpu.memory_space<vmem>>, vector<32x64xf32>
    %c0_17 = arith.constant 0 : index
    %c0_18 = arith.constant 0 : index
    %19 = vector.load %arg2[%c0_17, %c0_18] : memref<1x32xf32, #tpu.memory_space<vmem>>, vector<1x32xf32>
    %20 = vector.shape_cast %19 : vector<1x32xf32> to vector<1x32xf32>
    %21 = vector.broadcast %20 : vector<1x32xf32> to vector<8x32xf32>
    %22 = math.tanh %21 : vector<8x32xf32>
    %23 = vector.broadcast %3 : vector<1x1xf32> to vector<1x32xf32>
    %24 = arith.mulf %23, %0 : vector<1x32xf32>
    %25 = arith.addf %24, %1 : vector<1x32xf32>
    %26 = vector.broadcast %8 : vector<8x8x1xf32> to vector<8x8x32xf32>
    %27 = arith.mulf %26, %15 : vector<8x8x32xf32>
    %28 = vector.shape_cast %2 : vector<1x32xf32> to vector<1x1x32xf32>
    %29 = vector.broadcast %28 : vector<1x1x32xf32> to vector<8x8x32xf32>
    %30 = arith.addf %29, %27 : vector<8x8x32xf32>
    %31 = vector.shape_cast %25 : vector<1x32xf32> to vector<1x1x32xf32>
    %32 = vector.broadcast %17 : vector<8x8x1xf32> to vector<8x8x32xf32>
    %33 = vector.broadcast %31 : vector<1x1x32xf32> to vector<8x8x32xf32>
    %34 = arith.mulf %32, %33 : vector<8x8x32xf32>
    %35 = arith.addf %30, %34 : vector<8x8x32xf32>
    %cst_19 = arith.constant dense<0.000000e+00> : vector<8x64xf32>
    %36 = tpu.matmul %22, %18, %cst_19 {dimension_numbers = #tpu.dot_dimension_numbers<[1], [0], [0], [1], [0, 0, 1, 1], [], []>} : vector<8x32xf32>, vector<32x64xf32>, vector<8x64xf32> -> vector<8x64xf32>
    %37 = vector.extract_strided_slice %36 {offsets = [0, 0], sizes = [8, 32], strides = [1, 1]} : vector<8x64xf32> to vector<8x32xf32>
    %38 = vector.extract_strided_slice %17 {offsets = [0, 0, 0], sizes = [1, 8, 1], strides = [1, 1, 1]} : vector<8x8x1xf32> to vector<1x8x1xf32>
    %39 = vector.shape_cast %38 : vector<1x8x1xf32> to vector<8x1xf32>
    %40 = vector.extract_strided_slice %36 {offsets = [0, 32], sizes = [8, 32], strides = [1, 1]} : vector<8x64xf32> to vector<8x32xf32>
    %41 = vector.broadcast %39 : vector<8x1xf32> to vector<8x32xf32>
    %42 = arith.mulf %41, %40 : vector<8x32xf32>
    %43 = arith.addf %37, %42 : vector<8x32xf32>
    %44 = vector.extract_strided_slice %35 {offsets = [0, 0, 0], sizes = [1, 8, 32], strides = [1, 1, 1]} : vector<8x8x32xf32> to vector<1x8x32xf32>
    %45 = vector.shape_cast %44 : vector<1x8x32xf32> to vector<8x32xf32>
    %46 = arith.addf %43, %45 : vector<8x32xf32>
    %47 = math.tanh %46 : vector<8x32xf32>
    %cst_20 = arith.constant dense<0.000000e+00> : vector<8x64xf32>
    %48 = tpu.matmul %47, %18, %cst_20 {dimension_numbers = #tpu.dot_dimension_numbers<[1], [0], [0], [1], [0, 0, 1, 1], [], []>} : vector<8x32xf32>, vector<32x64xf32>, vector<8x64xf32> -> vector<8x64xf32>
    %49 = vector.extract_strided_slice %48 {offsets = [0, 0], sizes = [8, 32], strides = [1, 1]} : vector<8x64xf32> to vector<8x32xf32>
    %50 = vector.extract_strided_slice %17 {offsets = [1, 0, 0], sizes = [1, 8, 1], strides = [1, 1, 1]} : vector<8x8x1xf32> to vector<1x8x1xf32>
    %51 = vector.shape_cast %50 : vector<1x8x1xf32> to vector<8x1xf32>
    %52 = vector.extract_strided_slice %48 {offsets = [0, 32], sizes = [8, 32], strides = [1, 1]} : vector<8x64xf32> to vector<8x32xf32>
    %53 = vector.broadcast %51 : vector<8x1xf32> to vector<8x32xf32>
    %54 = arith.mulf %53, %52 : vector<8x32xf32>
    %55 = arith.addf %49, %54 : vector<8x32xf32>
    %56 = vector.extract_strided_slice %35 {offsets = [1, 0, 0], sizes = [1, 8, 32], strides = [1, 1, 1]} : vector<8x8x32xf32> to vector<1x8x32xf32>
    %57 = vector.shape_cast %56 : vector<1x8x32xf32> to vector<8x32xf32>
    %58 = arith.addf %55, %57 : vector<8x32xf32>
    %59 = math.tanh %58 : vector<8x32xf32>
    %cst_21 = arith.constant dense<0.000000e+00> : vector<8x64xf32>
    %60 = tpu.matmul %59, %18, %cst_21 {dimension_numbers = #tpu.dot_dimension_numbers<[1], [0], [0], [1], [0, 0, 1, 1], [], []>} : vector<8x32xf32>, vector<32x64xf32>, vector<8x64xf32> -> vector<8x64xf32>
    %61 = vector.extract_strided_slice %60 {offsets = [0, 0], sizes = [8, 32], strides = [1, 1]} : vector<8x64xf32> to vector<8x32xf32>
    %62 = vector.extract_strided_slice %17 {offsets = [2, 0, 0], sizes = [1, 8, 1], strides = [1, 1, 1]} : vector<8x8x1xf32> to vector<1x8x1xf32>
    %63 = vector.shape_cast %62 : vector<1x8x1xf32> to vector<8x1xf32>
    %64 = vector.extract_strided_slice %60 {offsets = [0, 32], sizes = [8, 32], strides = [1, 1]} : vector<8x64xf32> to vector<8x32xf32>
    %65 = vector.broadcast %63 : vector<8x1xf32> to vector<8x32xf32>
    %66 = arith.mulf %65, %64 : vector<8x32xf32>
    %67 = arith.addf %61, %66 : vector<8x32xf32>
    %68 = vector.extract_strided_slice %35 {offsets = [2, 0, 0], sizes = [1, 8, 32], strides = [1, 1, 1]} : vector<8x8x32xf32> to vector<1x8x32xf32>
    %69 = vector.shape_cast %68 : vector<1x8x32xf32> to vector<8x32xf32>
    %70 = arith.addf %67, %69 : vector<8x32xf32>
    %71 = math.tanh %70 : vector<8x32xf32>
    %cst_22 = arith.constant dense<0.000000e+00> : vector<8x64xf32>
    %72 = tpu.matmul %71, %18, %cst_22 {dimension_numbers = #tpu.dot_dimension_numbers<[1], [0], [0], [1], [0, 0, 1, 1], [], []>} : vector<8x32xf32>, vector<32x64xf32>, vector<8x64xf32> -> vector<8x64xf32>
    %73 = vector.extract_strided_slice %72 {offsets = [0, 0], sizes = [8, 32], strides = [1, 1]} : vector<8x64xf32> to vector<8x32xf32>
    %74 = vector.extract_strided_slice %17 {offsets = [3, 0, 0], sizes = [1, 8, 1], strides = [1, 1, 1]} : vector<8x8x1xf32> to vector<1x8x1xf32>
    %75 = vector.shape_cast %74 : vector<1x8x1xf32> to vector<8x1xf32>
    %76 = vector.extract_strided_slice %72 {offsets = [0, 32], sizes = [8, 32], strides = [1, 1]} : vector<8x64xf32> to vector<8x32xf32>
    %77 = vector.broadcast %75 : vector<8x1xf32> to vector<8x32xf32>
    %78 = arith.mulf %77, %76 : vector<8x32xf32>
    %79 = arith.addf %73, %78 : vector<8x32xf32>
    %80 = vector.extract_strided_slice %35 {offsets = [3, 0, 0], sizes = [1, 8, 32], strides = [1, 1, 1]} : vector<8x8x32xf32> to vector<1x8x32xf32>
    %81 = vector.shape_cast %80 : vector<1x8x32xf32> to vector<8x32xf32>
    %82 = arith.addf %79, %81 : vector<8x32xf32>
    %83 = math.tanh %82 : vector<8x32xf32>
    %cst_23 = arith.constant dense<0.000000e+00> : vector<8x64xf32>
    %84 = tpu.matmul %83, %18, %cst_23 {dimension_numbers = #tpu.dot_dimension_numbers<[1], [0], [0], [1], [0, 0, 1, 1], [], []>} : vector<8x32xf32>, vector<32x64xf32>, vector<8x64xf32> -> vector<8x64xf32>
    %85 = vector.extract_strided_slice %84 {offsets = [0, 0], sizes = [8, 32], strides = [1, 1]} : vector<8x64xf32> to vector<8x32xf32>
    %86 = vector.extract_strided_slice %17 {offsets = [4, 0, 0], sizes = [1, 8, 1], strides = [1, 1, 1]} : vector<8x8x1xf32> to vector<1x8x1xf32>
    %87 = vector.shape_cast %86 : vector<1x8x1xf32> to vector<8x1xf32>
    %88 = vector.extract_strided_slice %84 {offsets = [0, 32], sizes = [8, 32], strides = [1, 1]} : vector<8x64xf32> to vector<8x32xf32>
    %89 = vector.broadcast %87 : vector<8x1xf32> to vector<8x32xf32>
    %90 = arith.mulf %89, %88 : vector<8x32xf32>
    %91 = arith.addf %85, %90 : vector<8x32xf32>
    %92 = vector.extract_strided_slice %35 {offsets = [4, 0, 0], sizes = [1, 8, 32], strides = [1, 1, 1]} : vector<8x8x32xf32> to vector<1x8x32xf32>
    %93 = vector.shape_cast %92 : vector<1x8x32xf32> to vector<8x32xf32>
    %94 = arith.addf %91, %93 : vector<8x32xf32>
    %95 = math.tanh %94 : vector<8x32xf32>
    %cst_24 = arith.constant dense<0.000000e+00> : vector<8x64xf32>
    %96 = tpu.matmul %95, %18, %cst_24 {dimension_numbers = #tpu.dot_dimension_numbers<[1], [0], [0], [1], [0, 0, 1, 1], [], []>} : vector<8x32xf32>, vector<32x64xf32>, vector<8x64xf32> -> vector<8x64xf32>
    %97 = vector.extract_strided_slice %96 {offsets = [0, 0], sizes = [8, 32], strides = [1, 1]} : vector<8x64xf32> to vector<8x32xf32>
    %98 = vector.extract_strided_slice %17 {offsets = [5, 0, 0], sizes = [1, 8, 1], strides = [1, 1, 1]} : vector<8x8x1xf32> to vector<1x8x1xf32>
    %99 = vector.shape_cast %98 : vector<1x8x1xf32> to vector<8x1xf32>
    %100 = vector.extract_strided_slice %96 {offsets = [0, 32], sizes = [8, 32], strides = [1, 1]} : vector<8x64xf32> to vector<8x32xf32>
    %101 = vector.broadcast %99 : vector<8x1xf32> to vector<8x32xf32>
    %102 = arith.mulf %101, %100 : vector<8x32xf32>
    %103 = arith.addf %97, %102 : vector<8x32xf32>
    %104 = vector.extract_strided_slice %35 {offsets = [5, 0, 0], sizes = [1, 8, 32], strides = [1, 1, 1]} : vector<8x8x32xf32> to vector<1x8x32xf32>
    %105 = vector.shape_cast %104 : vector<1x8x32xf32> to vector<8x32xf32>
    %106 = arith.addf %103, %105 : vector<8x32xf32>
    %107 = math.tanh %106 : vector<8x32xf32>
    %cst_25 = arith.constant dense<0.000000e+00> : vector<8x64xf32>
    %108 = tpu.matmul %107, %18, %cst_25 {dimension_numbers = #tpu.dot_dimension_numbers<[1], [0], [0], [1], [0, 0, 1, 1], [], []>} : vector<8x32xf32>, vector<32x64xf32>, vector<8x64xf32> -> vector<8x64xf32>
    %109 = vector.extract_strided_slice %108 {offsets = [0, 0], sizes = [8, 32], strides = [1, 1]} : vector<8x64xf32> to vector<8x32xf32>
    %110 = vector.extract_strided_slice %17 {offsets = [6, 0, 0], sizes = [1, 8, 1], strides = [1, 1, 1]} : vector<8x8x1xf32> to vector<1x8x1xf32>
    %111 = vector.shape_cast %110 : vector<1x8x1xf32> to vector<8x1xf32>
    %112 = vector.extract_strided_slice %108 {offsets = [0, 32], sizes = [8, 32], strides = [1, 1]} : vector<8x64xf32> to vector<8x32xf32>
    %113 = vector.broadcast %111 : vector<8x1xf32> to vector<8x32xf32>
    %114 = arith.mulf %113, %112 : vector<8x32xf32>
    %115 = arith.addf %109, %114 : vector<8x32xf32>
    %116 = vector.extract_strided_slice %35 {offsets = [6, 0, 0], sizes = [1, 8, 32], strides = [1, 1, 1]} : vector<8x8x32xf32> to vector<1x8x32xf32>
    %117 = vector.shape_cast %116 : vector<1x8x32xf32> to vector<8x32xf32>
    %118 = arith.addf %115, %117 : vector<8x32xf32>
    %119 = math.tanh %118 : vector<8x32xf32>
    %cst_26 = arith.constant dense<0.000000e+00> : vector<8x64xf32>
    %120 = tpu.matmul %119, %18, %cst_26 {dimension_numbers = #tpu.dot_dimension_numbers<[1], [0], [0], [1], [0, 0, 1, 1], [], []>} : vector<8x32xf32>, vector<32x64xf32>, vector<8x64xf32> -> vector<8x64xf32>
    %121 = vector.extract_strided_slice %120 {offsets = [0, 0], sizes = [8, 32], strides = [1, 1]} : vector<8x64xf32> to vector<8x32xf32>
    %122 = vector.extract_strided_slice %17 {offsets = [7, 0, 0], sizes = [1, 8, 1], strides = [1, 1, 1]} : vector<8x8x1xf32> to vector<1x8x1xf32>
    %123 = vector.shape_cast %122 : vector<1x8x1xf32> to vector<8x1xf32>
    %124 = vector.extract_strided_slice %120 {offsets = [0, 32], sizes = [8, 32], strides = [1, 1]} : vector<8x64xf32> to vector<8x32xf32>
    %125 = vector.broadcast %123 : vector<8x1xf32> to vector<8x32xf32>
    %126 = arith.mulf %125, %124 : vector<8x32xf32>
    %127 = arith.addf %121, %126 : vector<8x32xf32>
    %128 = vector.extract_strided_slice %35 {offsets = [7, 0, 0], sizes = [1, 8, 32], strides = [1, 1, 1]} : vector<8x8x32xf32> to vector<1x8x32xf32>
    %129 = vector.shape_cast %128 : vector<1x8x32xf32> to vector<8x32xf32>
    %130 = arith.addf %127, %129 : vector<8x32xf32>
    %131 = math.tanh %130 : vector<8x32xf32>
    %132 = arith.mulf %47, %6 : vector<8x32xf32>
    %cst_27 = arith.constant dense<0.000000e+00> : vector<8xf32>
    %133 = vector.multi_reduction <add>, %132, %cst_27 [1] : vector<8x32xf32> to vector<8xf32>
    %134 = vector.shape_cast %133 : vector<8xf32> to vector<8x1xf32>
    %135 = arith.mulf %59, %6 : vector<8x32xf32>
    %cst_28 = arith.constant dense<0.000000e+00> : vector<8xf32>
    %136 = vector.multi_reduction <add>, %135, %cst_28 [1] : vector<8x32xf32> to vector<8xf32>
    %137 = vector.shape_cast %136 : vector<8xf32> to vector<8x1xf32>
    %138 = arith.mulf %71, %6 : vector<8x32xf32>
    %cst_29 = arith.constant dense<0.000000e+00> : vector<8xf32>
    %139 = vector.multi_reduction <add>, %138, %cst_29 [1] : vector<8x32xf32> to vector<8xf32>
    %140 = vector.shape_cast %139 : vector<8xf32> to vector<8x1xf32>
    %141 = arith.mulf %83, %6 : vector<8x32xf32>
    %cst_30 = arith.constant dense<0.000000e+00> : vector<8xf32>
    %142 = vector.multi_reduction <add>, %141, %cst_30 [1] : vector<8x32xf32> to vector<8xf32>
    %143 = vector.shape_cast %142 : vector<8xf32> to vector<8x1xf32>
    %144 = arith.mulf %95, %6 : vector<8x32xf32>
    %cst_31 = arith.constant dense<0.000000e+00> : vector<8xf32>
    %145 = vector.multi_reduction <add>, %144, %cst_31 [1] : vector<8x32xf32> to vector<8xf32>
    %146 = vector.shape_cast %145 : vector<8xf32> to vector<8x1xf32>
    %147 = arith.mulf %107, %6 : vector<8x32xf32>
    %cst_32 = arith.constant dense<0.000000e+00> : vector<8xf32>
    %148 = vector.multi_reduction <add>, %147, %cst_32 [1] : vector<8x32xf32> to vector<8xf32>
    %149 = vector.shape_cast %148 : vector<8xf32> to vector<8x1xf32>
    %150 = arith.mulf %119, %6 : vector<8x32xf32>
    %cst_33 = arith.constant dense<0.000000e+00> : vector<8xf32>
    %151 = vector.multi_reduction <add>, %150, %cst_33 [1] : vector<8x32xf32> to vector<8xf32>
    %152 = vector.shape_cast %151 : vector<8xf32> to vector<8x1xf32>
    %153 = arith.mulf %131, %6 : vector<8x32xf32>
    %cst_34 = arith.constant dense<0.000000e+00> : vector<8xf32>
    %154 = vector.multi_reduction <add>, %153, %cst_34 [1] : vector<8x32xf32> to vector<8xf32>
    %155 = vector.shape_cast %154 : vector<8xf32> to vector<8x1xf32>
    %156 = tpu.concatenate %134, %137, %140, %143, %146, %149, %152, %155 in 1 : vector<8x1xf32>, vector<8x1xf32>, vector<8x1xf32>, vector<8x1xf32>, vector<8x1xf32>, vector<8x1xf32>, vector<8x1xf32>, vector<8x1xf32> -> vector<8x8xf32>
    %157 = vector.broadcast %3 : vector<1x1xf32> to vector<8x8xf32>
    %158 = arith.addf %156, %157 : vector<8x8xf32>
    %c0_35 = arith.constant 0 : index
    %c0_36 = arith.constant 0 : index
    %159 = vector.load %arg10[%c0_35, %c0_36] : memref<8x8xf32, #tpu.memory_space<vmem>>, vector<8x8xf32>
    tpu.vector_store %arg10[%c0_35, %c0_36], %158 {strides = array<i32>} : memref<8x8xf32, #tpu.memory_space<vmem>>, vector<8x8xf32>,
    %160 = tpu.concatenate %47, %59, %71, %83, %95, %107, %119, %131 in 1 : vector<8x32xf32>, vector<8x32xf32>, vector<8x32xf32>, vector<8x32xf32>, vector<8x32xf32>, vector<8x32xf32>, vector<8x32xf32>, vector<8x32xf32> -> vector<8x256xf32>
    %c0_37 = arith.constant 0 : index
    %c0_38 = arith.constant 0 : index
    %161 = vector.load %arg9[%c0_37, %c0_38] : memref<8x256xf32, #tpu.memory_space<vmem>>, vector<8x256xf32>
    tpu.vector_store %arg9[%c0_37, %c0_38], %160 {strides = array<i32>} : memref<8x256xf32, #tpu.memory_space<vmem>>, vector<8x256xf32>,
    return
  }
}

</mosaic_0001>

<bundles_post_ra>
// kernel: tpu_custom_call.1
= control target key start
LH: loop header
LB: loop body
LE: loop exit
PB: predicated region body
PF: predicated region fallthrough
CT: control target
= control target key end

     0   :  { %s1658_s0 = inlined_call_operand.vmem [shape: f32[8,8,1], index: 0, kind: input, shape index: {}]   ;;  %s1659_s1 = inlined_call_operand.vmem [shape: f32[8,8,1], index: 1, kind: input, shape index: {}]   ;;  %s1660_s2 = inlined_call_operand.vmem [shape: f32[1,32], index: 2, kind: input, shape index: {}]   ;;  %s1661_s3 = inlined_call_operand.vmem [shape: f32[32,64], index: 3, kind: input, shape index: {}]   ;;  %s1662_s4 = inlined_call_operand.vmem [shape: f32[1,32], index: 4, kind: input, shape index: {}]   ;;  %s1663_s5 = inlined_call_operand.vmem [shape: f32[1,32], index: 5, kind: input, shape index: {}]   ;;  %s1664_s6 = inlined_call_operand.vmem [shape: f32[1,32], index: 6, kind: input, shape index: {}]   ;;  %s1665_s7 = inlined_call_operand.vmem [shape: f32[1,32], index: 7, kind: input, shape index: {}]   ;;  %s1666_s8 = inlined_call_operand.<no memory space> [shape: f32[1,1], index: 8, kind: input, shape index: {}]   ;;  %s1667_s9 = inlined_call_operand.hbm [shape: f32[8,256], index: 9, kind: output, shape index: {0}]   ;;  %s1668_s10 = inlined_call_operand.hbm [shape: f32[8,8], index: 10, kind: output, shape index: {1}]  }
   0x1   :  { %v16_v0 = vstv %s1666_s8 }
   0x2   :  { %17 = vst [vmem:[#allocation2] sm:$0x1] %v16_v0 }
   0x3   :  { %18 = vsyncpa [#allocation4], 0  ;;  %v141_v1 = vld [vmem:[%s1661_s3] sm:$0xff]  ;;  %v142_v2 = vld [vmem:[%s1661_s3 + $0x8] sm:$0xff]  ;;  %v1315_v4 = vmov 0.0|0.0   ;;  %vm1316_vm0 = vmmov 0  }
   0x4   :  { %v143_v3 = vld [vmem:[%s1661_s3 + $0x10] sm:$0xff]  ;;  %1190 = vmatprep.subr.bf16.mxu0 %v1315_v4  ;;  %v1392_v5 = vpack.c.bf16 %v142_v2, %v141_v1  ;;  %v144_v6 = vld [vmem:[%s1661_s3 + $0x18] sm:$0xff]  ;;  %v1317_v7 = vmov 0.0   ;;  %v1052_v8 = vld [vmem:[%s1660_s2] ss:$0 sm:$0xff]  ;;  %v1318_v10 = vmov 0   ;;  %1196 = vmatprep.subr.bf16.mxu1 %v1315_v4 }
   0x5   :  { %1110 = vmatprep.mubr.msk.f32.mxu0 %vm1316_vm0, %v1317_v7  ;;  %v49_v9 = vld [vmem:[%s1658_s0] sm:$0xff]  ;;  %1249 = vtanh.f32 %v1052_v8  ;;  %1248 = vset.pattern.permute.xlu1 %v1318_v10  ;;  %v1409_v12 = vpack.c.bf16 %v144_v6, %v143_v3  ;;  %v58_v14 = vld [vmem:[%s1659_s1 + $0x8] sm:$0xff] }
   0x6   :  { %v57_v11 = vld [vmem:[%s1659_s1] sm:$0xff]  ;;  %1247 = vset.pattern.permute.xlu0 %v1318_v10  ;;  %1192 = vmatpush3.bf16.msra.mxu0 %v1392_v5 }
   0x7   :  { %67 = vperm.xlu1 %1248, %v49_v9   ;;  %v133_v13 = vsub.f32 1.0, %v57_v11  ;;  %1193 = vmatprep.subr.bf16.mxu0 %v1315_v4 }
   0x8   :  { %1198 = vmatpush3.bf16.msra.mxu1 %v1392_v5  ;;  %1121 = vmatprep.mubr.msk.f32.mxu1 %vm1316_vm0, %v1317_v7 }
   0x9   :  { %228 = vperm.xlu0 %1247, %v133_v13   ;;  %v1417_v15 = vld [vmem:[#allocation2] sm:$0x1]  ;;  %1199 = vmatprep.subr.bf16.mxu1 %v1315_v4 }
   0xa   :  { %19 = vsyncpa [#allocation6], 0  ;;  %1195 = vmatpush3.bf16.msra.mxu0 %v1409_v12  ;;  %v134_v16 = vsub.f32 1.0, %v58_v14  ;;  %vm288_vm1 = vcmask 261120   ;;  %v59_v18 = vld [vmem:[%s1659_s1 + $0x10] sm:$0xff]  ;;  %v60_v20 = vld [vmem:[%s1659_s1 + $0x18] sm:$0xff]  ;;  %v106_v35 = vlaneseq }
   0xb   :  { %166 = vperm.xlu1 %1248, %v57_v11   ;;  %1202 = vmatprep.subr.bf16.mxu0 %v1315_v4  ;;  %v135_v19 = vsub.f32 1.0, %v59_v18  ;;  %v136_v21 = vsub.f32 1.0, %v60_v20  ;;  %v61_v22 = vld [vmem:[%s1659_s1 + $0x20] sm:$0xff]  ;;  %v62_v24 = vld [vmem:[%s1659_s1 + $0x28] sm:$0xff]  ;;  %v63_v26 = vld [vmem:[%s1659_s1 + $0x30] sm:$0xff]  ;;  %s1319_s20 = smov 96  }
   0xc   :  { %1201 = vmatpush3.bf16.msra.mxu1 %v1409_v12  ;;  %v137_v23 = vsub.f32 1.0, %v61_v22  ;;  %v138_v25 = vsub.f32 1.0, %v62_v24  ;;  %v139_v27 = vsub.f32 1.0, %v63_v26  ;;  %v64_v28 = vld [vmem:[%s1659_s1 + $0x38] sm:$0xff]  ;;  %v50_v34 = vld [vmem:[%s1658_s0 + $0x8] sm:$0xff]  ;;  %v107_v36 = vshrl.u32 %v106_v35, 7 }
   0xd   :  { %155 = vperm.xlu0 %1247, %v1417_v15   ;;  %1208 = vmatprep.subr.bf16.mxu1 %v1315_v4  ;;  %v140_v29 = vsub.f32 1.0, %v64_v28  ;;  %v38_v38 = vld [vmem:[%s1663_s5] sm:$0x1]  ;;  %v51_v3 = vld [vmem:[%s1658_s0 + $0x10] sm:$0xff]  ;;  %s1320_s13 = smov 32   ;;  %s1321_s16 = smov 64  }
   0xe   :  { %v1456_v37 = vsub.s32 0, %v107_v36  ;;  %v39_v42 = vld [vmem:[%s1664_s6] sm:$0x1]  ;;  %vm969_vm2 = vcmask 7168   ;;  %vm971_vm3 = vcmask 15360   ;;  %vm973_vm4 = vcmask 23552  }
   0xf   :  { %233 = vperm.xlu1 %1248, %v134_v16   ;;  %v1250_v17 = vpop.eup %1249  ;;  %v1479_v52 = vld [vmem:[%s1662_s4] ss:$0 sm:$0xff]  ;;  %vm975_vm5 = vcmask 31744   ;;  %vm977_vm6 = vcmask 39936   ;;  %vm979_vm7 = vcmask 48128   ;;  %vm1016_vm8 = vcmask 785408  }
  0x10   :  { %1111 = vmatmul.mubr.msk.f32.vlgmr.msra.gmra.mrb[0].mxu0 %vm288_vm1, %v1250_v17  ;;  %v1462_v40 = vrot.slane %v38_v38, %v1456_v37  ;;  %v1469_v44 = vrot.slane %v39_v42, %v1456_v37  ;;  %v1486_v59 = vld [vmem:[%s1665_s7] ss:$0 sm:$0xff]  ;;  %vm1014_vm9 = vcmask 523264   ;;  %vm981_vm10 = vcmask 56320   ;;  %s1323_s18 = smov [#allocation3]  }
  0x11   :  { %1204 = vmatpush3.bf16.msra.mxu0 %v1392_v5  ;;  %1132 = vmatprep.mubr.msk.f32.mxu0 %vm1316_vm0, %v1317_v7  ;;  %s1029_s19 = sshll.u32 %s1323_s18, 4  ;;  %vm992_vm11 = vcmask 64512   ;;  %s1626_s19 = int_to_ptr.vmem [resolvable:$true] %s1029_s19 }
  0x12   :  { %1205 = vmatprep.subr.bf16.mxu0 %v1315_v4 }
  0x13   :  { %171 = vperm.xlu1 %1248, %v58_v14  }
  0x15   :  { %1207 = vmatpush3.bf16.msra.mxu0 %v1409_v12 }
  0x16   :  { %1214 = vmatprep.subr.bf16.mxu0 %v1315_v4 }
  0x17   :  { %238 = vperm.xlu1 %1248, %v135_v19  }
  0x1b   :  { %176 = vperm.xlu1 %1248, %v59_v18  }
  0x1f   :  { %243 = vperm.xlu1 %1248, %v136_v21  }
  0x23   :  { %181 = vperm.xlu1 %1248, %v60_v20  }
  0x27   :  { %248 = vperm.xlu1 %1248, %v137_v23  }
  0x2b   :  { %186 = vperm.xlu1 %1248, %v61_v22  }
  0x2f   :  { %253 = vperm.xlu1 %1248, %v138_v25   ;;  %v52_v25 = vld [vmem:[%s1658_s0 + $0x18] sm:$0xff] }
  0x33   :  { %191 = vperm.xlu1 %1248, %v62_v24  }
  0x37   :  { %258 = vperm.xlu1 %1248, %v139_v27  }
  0x3b   :  { %196 = vperm.xlu1 %1248, %v63_v26  }
  0x3f   :  { %263 = vperm.xlu1 %1248, %v140_v29  }
  0x43   :  { %201 = vperm.xlu1 %1248, %v64_v28  }
  0x86   :  { %v68_v43 = vpop.permute.xlu1 %67 }
  0x87   :  { %v111_v45 = vmul.f32 %v1462_v40, %v68_v43 }
  0x88   :  { %v229_v30 = vpop.permute.xlu0 %228 }
  0x89   :  { %v125_v47 = vadd.f32 %v1469_v44, %v111_v45  ;;  %v53_v45 = vld [vmem:[%s1658_s0 + $0x20] sm:$0xff] }
  0x8a   :  { %v167_v49 = vpop.permute.xlu1 %166 }
  0x8b   :  { %v204_v50 = vmul.f32 %v167_v49, %v125_v47 }
  0x8c   :  { %v156_v39 = vpop.permute.xlu0 %155 }
  0x8d   :  { %v161_v41 = vrot.slane %v156_v39, %v1456_v37  ;;  %v218_v53 = vadd.f32 %v1479_v52, %v204_v50 }
  0x8e   :  { %v234_v63 = vpop.permute.xlu1 %233 }
  0x8f   :  { %v162_v46 = vmul.f32 %v161_v41, %v38_v38 }
  0x91   :  { %v163_v48 = vadd.f32 %v162_v46, %v39_v42 }
  0x92   :  { %v172_v10 = vpop.permute.xlu1 %171 }
  0x93   :  { %v1474_v51 = vrot.slane %v163_v48, %v1456_v37 }
  0x95   :  { %v272_v54 = vmul.f32 %v1474_v51, %v229_v30  ;;  %v273_v14 = vmul.f32 %v1474_v51, %v234_v63 }
  0x96   :  { %v239_v21 = vpop.permute.xlu1 %238 }
  0x97   :  { %v280_v56 = vadd.f32 %v272_v54, %v218_v53 }
  0x9a   :  { %v177_v29 = vpop.permute.xlu1 %176 }
  0x9e   :  { %v244_v39 = vpop.permute.xlu1 %243 }
  0x9f   :  { %v275_v54 = vmul.f32 %v1474_v51, %v244_v39 }
  0xa2   :  { %v182_v49 = vpop.permute.xlu1 %181 }
  0xe3   :  { %v358_v31 = vpop.f32.mrb[0].mxu0 }
  0xe4   :  { %v362_v32 = vmul.f32 %v358_v31, %v229_v30  ;;  %v1112_v33 = vpop.f32.mrb[1].mxu0 }
  0xe6   :  { %364 = vrot.lane.b32.xlu0 %v362_v32, %s1319_s20  ;;  %v274_v32 = vmul.f32 %v1474_v51, %v239_v21 }
  0xea   :  { %72 = vperm.xlu0 %1247, %v50_v34  }
 0x158   :  { %v365_v55 = vpop.permute.xlu0 %364 }
 0x159   :  { %v367_v57 = vadd.f32 %v365_v55, %v358_v31 }
 0x15b   :  { %v368_v58 = vadd.f32 %v367_v57, %v280_v56 }
 0x15d   :  { %1251 = vtanh.f32 %v368_v58 }
 0x167   :  { %v1488_v60 = vpop.eup %1251 }
 0x168   :  { %1122 = vmatmul.mubr.msk.f32.vlgmr.msra.gmra.mrb[0].mxu1 %vm288_vm1, %v1488_v60  ;;  %v937_v61 = vmul.f32 %v1488_v60, %v1486_v59 }
 0x169   :  { %1210 = vmatpush3.bf16.msra.mxu1 %v1392_v5  ;;  %1143 = vmatprep.mubr.msk.f32.mxu1 %vm1316_vm0, %v1317_v7  ;;  %v73_v6 = vpop.permute.xlu0 %72 }
 0x16a   :  { %v938_v62 = vsel %vm288_vm1, %v937_v61, 0.0  ;;  %1211 = vmatprep.subr.bf16.mxu1 %v1315_v4  ;;  %v112_v8 = vmul.f32 %v1462_v40, %v73_v6  ;;  %v54_v6 = vld [vmem:[%s1658_s0 + $0x28] sm:$0xff] }
 0x16b   :  { %939 = vadd.xlane.f32.xlu1 %v938_v62 }
 0x16c   :  { %v126_v9 = vadd.f32 %v1469_v44, %v112_v8 }
 0x16d   :  { %1213 = vmatpush3.bf16.msra.mxu1 %v1409_v12 }
 0x16e   :  { %1220 = vmatprep.subr.bf16.mxu1 %v1315_v4  ;;  %v205_v11 = vmul.f32 %v172_v10, %v126_v9 }
 0x170   :  { %v219_v13 = vadd.f32 %v1479_v52, %v205_v11 }
 0x172   :  { %v281_v17 = vadd.f32 %v273_v14, %v219_v13 }
 0x23b   :  { %v439_v0 = vpop.f32.mrb[0].mxu1 }
 0x23c   :  { %v443_v1 = vmul.f32 %v439_v0, %v234_v63  ;;  %v1123_v2 = vpop.f32.mrb[1].mxu1 }
 0x23e   :  { %445 = vrot.lane.b32.xlu0 %v443_v1, %s1319_s20 }
 0x242   :  { %77 = vperm.xlu0 %1247, %v51_v3  }
 0x2b0   :  { %v446_v16 = vpop.permute.xlu0 %445 }
 0x2b1   :  { %v448_v18 = vadd.f32 %v446_v16, %v439_v0  ;;  %v249_v0 = vpop.permute.xlu1 %248 }
 0x2b2   :  { %v276_v16 = vmul.f32 %v1474_v51, %v249_v0 }
 0x2b3   :  { %v449_v19 = vadd.f32 %v448_v18, %v281_v17 }
 0x2b5   :  { %1253 = vtanh.f32 %v449_v19  ;;  %v187_v11 = vpop.permute.xlu1 %186 }
 0x2bf   :  { %v1509_v20 = vpop.eup %1253 }
 0x2c0   :  { %1133 = vmatmul.mubr.msk.f32.vlgmr.msra.gmra.mrb[2].mxu0 %vm288_vm1, %v1509_v20 }
 0x2c1   :  { %1216 = vmatpush3.bf16.msra.mxu0 %v1392_v5  ;;  %1154 = vmatprep.mubr.msk.f32.mxu0 %vm1316_vm0, %v1317_v7  ;;  %v78_v26 = vpop.permute.xlu0 %77 }
 0x2c2   :  { %1217 = vmatprep.subr.bf16.mxu0 %v1315_v4  ;;  %v113_v27 = vmul.f32 %v1462_v40, %v78_v26 }
 0x2c4   :  { %v127_v28 = vadd.f32 %v1469_v44, %v113_v27  ;;  %v55_v27 = vld [vmem:[%s1658_s0 + $0x30] sm:$0xff] }
 0x2c5   :  { %1219 = vmatpush3.bf16.msra.mxu0 %v1409_v12 }
 0x2c6   :  { %1226 = vmatprep.subr.bf16.mxu0 %v1315_v4  ;;  %v206_v30 = vmul.f32 %v177_v29, %v127_v28 }
 0x2c8   :  { %v220_v31 = vadd.f32 %v1479_v52, %v206_v30 }
 0x2ca   :  { %v282_v34 = vadd.f32 %v274_v32, %v220_v31 }
 0x393   :  { %v520_v22 = vpop.f32.mrb[2].mxu0 }
 0x394   :  { %v524_v23 = vmul.f32 %v520_v22, %v239_v21  ;;  %v1134_v24 = vpop.f32.mrb[3].mxu0 }
 0x396   :  { %526 = vrot.lane.b32.xlu0 %v524_v23, %s1319_s20  ;;  %v254_v23 = vpop.permute.xlu1 %253 }
 0x397   :  { %v277_v30 = vmul.f32 %v1474_v51, %v254_v23 }
 0x39a   :  { %82 = vperm.xlu0 %1247, %v52_v25   ;;  %v192_v29 = vpop.permute.xlu1 %191 }
 0x408   :  { %v527_v33 = vpop.permute.xlu0 %526 }
 0x409   :  { %v529_v35 = vadd.f32 %v527_v33, %v520_v22 }
 0x40b   :  { %v530_v36 = vadd.f32 %v529_v35, %v282_v34 }
 0x40d   :  { %1255 = vtanh.f32 %v530_v36 }
 0x417   :  { %v1527_v38 = vpop.eup %1255 }
 0x418   :  { %1144 = vmatmul.mubr.msk.f32.vlgmr.msra.gmra.mrb[2].mxu1 %vm288_vm1, %v1527_v38 }
 0x419   :  { %1222 = vmatpush3.bf16.msra.mxu1 %v1392_v5  ;;  %1165 = vmatprep.mubr.msk.f32.mxu1 %vm1316_vm0, %v1317_v7  ;;  %v83_v46 = vpop.permute.xlu0 %82 }
 0x41a   :  { %1223 = vmatprep.subr.bf16.mxu1 %v1315_v4  ;;  %v114_v47 = vmul.f32 %v1462_v40, %v83_v46  ;;  %v56_v46 = vld [vmem:[%s1658_s0 + $0x38] sm:$0xff]  ;;  %s1322_s0 = smov [#allocation5]  }
 0x41b   :  { %s1039_s17 = sshll.u32 %s1322_s0, 4  ;;  %s1040_s17 = int_to_ptr.vmem [resolvable:$true] %s1039_s17 }
 0x41c   :  { %v128_v48 = vadd.f32 %v1469_v44, %v114_v47  ;;  %p1272_p1 = scmp.lt.s32.totalorder %s1040_s17, %s1040_s17 }
 0x41d   :  { %1225 = vmatpush3.bf16.msra.mxu1 %v1409_v12 }
 0x41e   :  { %1232 = vmatprep.subr.bf16.mxu1 %v1315_v4  ;;  %v207_v50 = vmul.f32 %v182_v49, %v128_v48 }
 0x420   :  { %v221_v53 = vadd.f32 %v1479_v52, %v207_v50 }
 0x422   :  { %v283_v56 = vadd.f32 %v275_v54, %v221_v53 }
 0x4eb   :  { %v601_v41 = vpop.f32.mrb[2].mxu1 }
 0x4ec   :  { %v605_v42 = vmul.f32 %v601_v41, %v244_v39  ;;  %v1145_v43 = vpop.f32.mrb[3].mxu1 }
 0x4ee   :  { %607 = vrot.lane.b32.xlu0 %v605_v42, %s1319_s20 }
 0x4f2   :  { %87 = vperm.xlu0 %1247, %v53_v45  }
 0x560   :  { %v608_v55 = vpop.permute.xlu0 %607 }
 0x561   :  { %v610_v57 = vadd.f32 %v608_v55, %v601_v41  ;;  %v259_v41 = vpop.permute.xlu1 %258 }
 0x562   :  { %v278_v55 = vmul.f32 %v1474_v51, %v259_v41 }
 0x563   :  { %v611_v58 = vadd.f32 %v610_v57, %v283_v56 }
 0x565   :  { %1257 = vtanh.f32 %v611_v58  ;;  %v197_v50 = vpop.permute.xlu1 %196 }
 0x56f   :  { %v1545_v61 = vpop.eup %1257 }
 0x570   :  { %1155 = vmatmul.mubr.msk.f32.vlgmr.msra.gmra.mrb[4].mxu0 %vm288_vm1, %v1545_v61  ;;  %v949_v62 = vmul.f32 %v1545_v61, %v1486_v59 }
 0x571   :  { %1228 = vmatpush3.bf16.msra.mxu0 %v1392_v5  ;;  %1176 = vmatprep.mubr.msk.f32.mxu0 %vm1316_vm0, %v1317_v7  ;;  %v88_v8 = vpop.permute.xlu0 %87 }
 0x572   :  { %v950_v63 = vsel %vm288_vm1, %v949_v62, 0.0  ;;  %1229 = vmatprep.subr.bf16.mxu0 %v1315_v4  ;;  %v115_v9 = vmul.f32 %v1462_v40, %v88_v8 }
 0x573   :  { %951 = vadd.xlane.f32.xlu1 %v950_v63 }
 0x574   :  { %v129_v10 = vadd.f32 %v1469_v44, %v115_v9  ;;  %v945_v9 = vmul.f32 %v1527_v38, %v1486_v59 }
 0x575   :  { %1231 = vmatpush3.bf16.msra.mxu0 %v1409_v12 }
 0x576   :  { %v208_v13 = vmul.f32 %v187_v11, %v129_v10  ;;  %v946_v10 = vsel %vm288_vm1, %v945_v9, 0.0 }
 0x578   :  { %v222_v14 = vadd.f32 %v1479_v52, %v208_v13 }
 0x57a   :  { %v284_v18 = vadd.f32 %v276_v16, %v222_v14 }
 0x643   :  { %v682_v1 = vpop.f32.mrb[4].mxu0 }
 0x644   :  { %v686_v2 = vmul.f32 %v682_v1, %v249_v0  ;;  %v1156_v3 = vpop.f32.mrb[5].mxu0  ;;  %v264_v0 = vpop.permute.xlu1 %263 }
 0x646   :  { %688 = vrot.lane.b32.xlu0 %v686_v2, %s1319_s20 }
 0x64a   :  { %92 = vperm.xlu0 %1247, %v54_v6   ;;  %v941_v6 = vmul.f32 %v1509_v20, %v1486_v59 }
 0x64c   :  { %v942_v8 = vsel %vm288_vm1, %v941_v6, 0.0 }
 0x6b8   :  { %v689_v17 = vpop.permute.xlu0 %688 }
 0x6b9   :  { %v691_v19 = vadd.f32 %v689_v17, %v682_v1 }
 0x6bb   :  { %v692_v21 = vadd.f32 %v691_v19, %v284_v18 }
 0x6bd   :  { %1259 = vtanh.f32 %v692_v21  ;;  %v202_v21 = vpop.permute.xlu1 %201 }
 0x6c7   :  { %v1565_v22 = vpop.eup %1259 }
 0x6c8   :  { %1166 = vmatmul.mubr.msk.f32.vlgmr.msra.gmra.mrb[4].mxu1 %vm288_vm1, %v1565_v22  ;;  %v953_v11 = vmul.f32 %v1565_v22, %v1486_v59 }
 0x6c9   :  { %1234 = vmatpush3.bf16.msra.mxu1 %v1392_v5  ;;  %1187 = vmatprep.mubr.msk.f32.mxu1 %vm1316_vm0, %v1317_v7  ;;  %v93_v28 = vpop.permute.xlu0 %92 }
 0x6ca   :  { %1235 = vmatprep.subr.bf16.mxu1 %v1315_v4  ;;  %v116_v5 = vmul.f32 %v1462_v40, %v93_v28  ;;  %v954_v13 = vsel %vm288_vm1, %v953_v11, 0.0 }
 0x6cc   :  { %v130_v7 = vadd.f32 %v1469_v44, %v116_v5 }
 0x6cd   :  { %1237 = vmatpush3.bf16.msra.mxu1 %v1409_v12 }
 0x6ce   :  { %v209_v4 = vmul.f32 %v192_v29, %v130_v7 }
 0x6d0   :  { %v223_v12 = vadd.f32 %v1479_v52, %v209_v4 }
 0x6d2   :  { %v285_v32 = vadd.f32 %v277_v30, %v223_v12 }
 0x79b   :  { %v763_v24 = vpop.f32.mrb[4].mxu1 }
 0x79c   :  { %v767_v25 = vmul.f32 %v763_v24, %v254_v23  ;;  %v1167_v26 = vpop.f32.mrb[5].mxu1 }
 0x79e   :  { %769 = vrot.lane.b32.xlu0 %v767_v25, %s1319_s20  ;;  %v279_v25 = vmul.f32 %v1474_v51, %v264_v0 }
 0x7a2   :  { %97 = vperm.xlu0 %1247, %v55_v27  }
 0x810   :  { %v770_v31 = vpop.permute.xlu0 %769 }
 0x811   :  { %v772_v33 = vadd.f32 %v770_v31, %v763_v24 }
 0x813   :  { %v773_v34 = vadd.f32 %v772_v33, %v285_v32 }
 0x815   :  { %1261 = vtanh.f32 %v773_v34 }
 0x81f   :  { %v1262_v35 = vpop.eup %1261 }
 0x820   :  { %1177 = vmatmul.mubr.msk.f32.vlgmr.msra.gmra.mrb[6].mxu0 %vm288_vm1, %v1262_v35  ;;  %v957_v36 = vmul.f32 %v1262_v35, %v1486_v59 }
 0x821   :  { %v98_v47 = vpop.permute.xlu0 %97 }
 0x822   :  { %v958_v39 = vsel %vm288_vm1, %v957_v36, 0.0  ;;  %v117_v48 = vmul.f32 %v1462_v40, %v98_v47 }
 0x823   :  { %959 = vadd.xlane.f32.xlu1 %v958_v39 }
 0x824   :  { %v131_v49 = vadd.f32 %v1469_v44, %v117_v48 }
 0x826   :  { %v210_v53 = vmul.f32 %v197_v50, %v131_v49 }
 0x828   :  { %v224_v54 = vadd.f32 %v1479_v52, %v210_v53 }
 0x82a   :  { %v286_v57 = vadd.f32 %v278_v55, %v224_v54 }
 0x834   :  { %994 = vrot.lane.b32.xlu1 %v1509_v20, %s1320_s13  ;;  %v986_v20 = vrot.slane %v1417_v15, %v1456_v37 }
 0x838   :  { %1003 = vrot.lane.b32.xlu1 %v1262_v35, %s1320_s13 }
 0x8f3   :  { %v844_v42 = vpop.f32.mrb[6].mxu0 }
 0x8f4   :  { %v848_v43 = vmul.f32 %v844_v42, %v259_v41  ;;  %v1178_v45 = vpop.f32.mrb[7].mxu0 }
 0x8f6   :  { %850 = vrot.lane.b32.xlu0 %v848_v43, %s1319_s20 }
 0x8fa   :  { %102 = vperm.xlu0 %1247, %v56_v46  }
 0x968   :  { %v851_v56 = vpop.permute.xlu0 %850 }
 0x969   :  { %v853_v58 = vadd.f32 %v851_v56, %v844_v42 }
 0x96b   :  { %v854_v62 = vadd.f32 %v853_v58, %v286_v57 }
 0x96d   :  { %1263 = vtanh.f32 %v854_v62 }
 0x977   :  { %v1264_v63 = vpop.eup %1263 }
 0x978   :  { %1006 = vrot.lane.b32.xlu1 %v1264_v63, %s1321_s16  ;;  %1188 = vmatmul.mubr.msk.f32.vlgmr.msra.gmra.mrb[6].mxu1 %vm288_vm1, %v1264_v63  ;;  %v961_v14 = vmul.f32 %v1264_v63, %v1486_v59 }
 0x979   :  { %v103_v17 = vpop.permute.xlu0 %102 }
 0x97a   :  { %v962_v16 = vsel %vm288_vm1, %v961_v14, 0.0  ;;  %v118_v18 = vmul.f32 %v1462_v40, %v103_v17 }
 0x97c   :  { %v132_v19 = vadd.f32 %v1469_v44, %v118_v18  ;;  %v940_v44 = vpop.xlane.xlu1 %939 }
 0x97e   :  { %v211_v23 = vmul.f32 %v202_v21, %v132_v19 }
 0x980   :  { %v225_v24 = vadd.f32 %v1479_v52, %v211_v23  ;;  %v952_v7 = vpop.xlane.xlu1 %951 }
 0x982   :  { %v287_v27 = vadd.f32 %v279_v25, %v225_v24 }
 0xa4b   :  { %v925_v1 = vpop.f32.mrb[6].mxu1 }
 0xa4c   :  { %v929_v2 = vmul.f32 %v925_v1, %v264_v0  ;;  %v1189_v3 = vpop.f32.mrb[7].mxu1 }
 0xa4e   :  { %931 = vrot.lane.b32.xlu0 %v929_v2, %s1319_s20 }
 0xa6d   :  { %943 = vadd.xlane.f32.xlu0 %v942_v8 }
 0xa71   :  { %947 = vadd.xlane.f32.xlu0 %v946_v10 }
 0xa75   :  { %955 = vadd.xlane.f32.xlu0 %v954_v13 }
 0xa79   :  { %963 = vadd.xlane.f32.xlu0 %v962_v16 }
 0xa8f   :  { %988 = vperm.xlu0 %1247, %v986_v20  }
 0xa93   :  { %997 = vrot.lane.b32.xlu0 %v1527_v38, %s1321_s16 }
 0xa97   :  { %1000 = vrot.lane.b32.xlu0 %v1545_v61, %s1319_s20 }
 0xac0   :  { %v932_v26 = vpop.permute.xlu0 %931 }
 0xac1   :  { %v934_v15 = vadd.f32 %v932_v26, %v925_v1 }
 0xac3   :  { %v935_v37 = vadd.f32 %v934_v15, %v287_v27 }
 0xac5   :  { %1265 = vtanh.f32 %v935_v37 }
 0xacf   :  { %v1266_v38 = vpop.eup %1265 }
 0xad0   :  { %v965_v28 = vmul.f32 %v1266_v38, %v1486_v59  ;;  %v960_v59 = vpop.xlane.xlu1 %959 }
 0xad2   :  { %v966_v61 = vsel %vm288_vm1, %v965_v28, 0.0 }
 0xad3   :  { %967 = vadd.xlane.f32.xlu1 %v966_v61 }
 0xad4   :  { %v995_v34 = vpop.permute.xlu1 %994 }
 0xad5   :  { %v1013_v36 = vsel %vm288_vm1, %v1488_v60, %v995_v34 }
 0xad8   :  { %v1004_v43 = vpop.permute.xlu1 %1003 }
 0xad9   :  { %v1018_v60 = vsel %vm288_vm1, %v1565_v22, %v1004_v43 }
 0xadc   :  { %v1007_v45 = vpop.permute.xlu1 %1006 }
 0xadd   :  { %v1019_v49 = vsel %vm1014_vm9, %v1018_v60, %v1007_v45 }
 0xae4   :  { %1010 = vrot.lane.b32.xlu1 %v1266_v38, %s1319_s20  ;;  %s1267_s20 = scalar_lea.vmem %s1040_s17, 128 }
 0xae5   :  { %p1268_p0 = scmp.ne.s32.totalorder %s1040_s17, %s1267_s20  ;;  %p1273_p2 = scmp.lt.s32.totalorder %s1267_s20, %s1267_s20 }
 0xae7   :  { %p1274_p3 = por %p1273_p2, %p1272_p1 }
 0xae9   :  { %p1275_p4 = pnand %p1274_p3, %p1268_p0 }
 0xafa   :  { %v944_v40 = vpop.xlane.xlu0 %943 }
 0xafb   :  { %v970_v52 = vsel %vm969_vm2, %v940_v44, %v944_v40 }
 0xafe   :  { %v948_v5 = vpop.xlane.xlu0 %947 }
 0xaff   :  { %v972_v51 = vsel %vm971_vm3, %v970_v52, %v948_v5 }
 0xb00   :  { %v974_v29 = vsel %vm973_vm4, %v972_v51, %v952_v7 }
 0xb02   :  { %v956_v4 = vpop.xlane.xlu0 %955 }
 0xb03   :  { %v976_v12 = vsel %vm975_vm5, %v974_v29, %v956_v4 }
 0xb04   :  { %v978_v30 = vsel %vm977_vm6, %v976_v12, %v960_v59 }
 0xb06   :  { %v964_v31 = vpop.xlane.xlu0 %963 }
 0xb07   :  { %v980_v32 = vsel %vm979_vm7, %v978_v30, %v964_v31 }
 0xb0e   :  { %v989_v33 = vpop.permute.xlu0 %988 }
 0xb12   :  { %v998_v35 = vpop.permute.xlu0 %997 }
 0xb13   :  { %v1015_v39 = vsel %vm1014_vm9, %v1013_v36, %v998_v35 }
 0xb16   :  { %v1001_v41 = vpop.permute.xlu0 %1000 }
 0xb17   :  { %v1017_v42 = vsel %vm1016_vm8, %v1015_v39, %v1001_v41 }
 0xb18   :  { %1021 = vst [vmem:[#allocation3] sm:$0xff] %v1017_v42 }
 0xb60   :  { %v968_v46 = vpop.xlane.xlu1 %967 }
 0xb61   :  { %v982_v47 = vsel %vm981_vm10, %v980_v32, %v968_v46 }
 0xb62   :  { %v991_v48 = vadd.f32 %v989_v33, %v982_v47 }
 0xb64   :  { %v1011_v50 = vpop.permute.xlu1 %1010  ;;  %993 = vst.msk [vmem:[#allocation5] sm:$0xff] %vm992_vm11, %v991_v48 }
 0xb65   :  { %v1020_v53 = vsel %vm1016_vm8, %v1019_v49, %v1011_v50 }
 0xb66   :  { %1278 = shalt.err (!%p1275_p4)
}
 0xb67   :  { %s1279_s1 = scalar_lea.hbm %s1668_s10, 128 }
 0xb68   :  { %p1280_p5 = scmp.ne.s32.totalorder %s1668_s10, %s1279_s1  ;;  %p1283_p6 = scmp.lt.u32.totalorder %s1279_s1, %s1668_s10 }
 0xb6a   :  { %p1285_p7 = pnand %p1283_p6, %p1280_p5 }
 0xb6c   :  { %1288 = shalt.err (!%p1285_p7)
}
 0xb6d   :  { %1042 = dma.vmem_to_hbm [thread:$0]  %s1040_s17, 128, %s1668_s10, [#allocation6]   ;;  %1022 = vst [vmem:[#allocation3 + $0x8] sm:$0xff] %v1020_v53 }
 0xb6e   :  { %s1289_s26 = scalar_lea.vmem %s1626_s19, 256  ;;  %p1294_p9 = scmp.lt.s32.totalorder %s1626_s19, %s1626_s19 }
 0xb6f   :  { %p1290_p8 = scmp.ne.s32.totalorder %s1626_s19, %s1289_s26  ;;  %p1295_p10 = scmp.lt.s32.totalorder %s1289_s26, %s1289_s26 }
 0xb71   :  { %p1296_p11 = por %p1295_p10, %p1294_p9 }
 0xb73   :  { %p1297_p12 = pnand %p1296_p11, %p1290_p8 }
 0xb75   :  { %1300 = shalt.err (!%p1297_p12)
}
 0xb76   :  { %s1301_s27 = scalar_lea.hbm %s1667_s9, 256 }
 0xb77   :  { %p1302_p13 = scmp.ne.s32.totalorder %s1667_s9, %s1301_s27  ;;  %p1305_p0 = scmp.lt.u32.totalorder %s1301_s27, %s1667_s9 }
 0xb79   :  { %p1307_p1 = pnand %p1305_p0, %p1302_p13 }
 0xb7b   :  { %1310 = shalt.err (!%p1307_p1)
}
 0xb7c   :  { %1032 = dma.vmem_to_hbm [thread:$0]  %s1626_s19, 256, %s1667_s9, [#allocation4]  }
 0xb7d   :  { %1311 = dma.done.wait [#allocation4], 256  }
 0xb7e   :  { %1312 = vsyncadd [#allocation4], 4294967040 }
 0xb7f   :  { %1313 = dma.done.wait [#allocation6], 128  }
 0xb80   :  { %1314 = vsyncadd [#allocation6], 4294967168 }
 0xb81   :  { %1049 = vsyncpa [#allocation4], 1 }
 0xb82   :  { %1050 = vsyncpa [#allocation6], 1 }

</bundles_post_ra>
